<compile_context>
chip_gen: v7x
topology: tpu7x:2x2x1
jax: 0.10.0
libtpu: 0.0.40
codegen_flags: <defaults>
</compile_context>

<pallas_src>
import functools

import jax
import jax.numpy as jnp
from jax.experimental import pallas as pl
from jax.experimental.pallas import tpu as pltpu


def _round_up(x, m):
    return (x + m - 1) // m * m


def _patch_embed_kernel(x_ref, w_ref, b_ref, o_ref):
    """One M-tile: (tm, K) @ (K, E_pad) -> f32 acc, + f32 bias, cast to out."""
    acc = jnp.dot(x_ref[...], w_ref[...], preferred_element_type=jnp.float32)
    o_ref[...] = (acc + b_ref[...]).astype(o_ref.dtype)


def _im2col(x, kernel_size, stride, padding):
    """(N, C, H, W) -> ((N*Hp*Wp, C*kh*kw), Hp, Wp); K ordered (C, kh, kw)."""
    kh, kw = kernel_size
    sh, sw = stride
    ph, pw = padding
    n, c, h, w = x.shape

    # Fast path: non-overlapping patches (standard PatchEmbed: stride==kernel,
    # no padding).  Pure reshape + one transpose, no data duplication.
    if (ph, pw) == (0, 0) and (sh, sw) == (kh, kw) and h % kh == 0 and w % kw == 0:
        hp, wp = h // kh, w // kw
        p = x.reshape(n, c, hp, kh, wp, kw)
        p = jnp.transpose(p, (0, 2, 4, 1, 3, 5))          # (N, Hp, Wp, C, kh, kw)
        return p.reshape(n * hp * wp, c * kh * kw), hp, wp

    # General path (padding and/or overlapping kernels): one strided slice per
    # filter tap, stacked.  Correct, but materializes the (kh*kw/(sh*sw))-times
    # duplicated im2col matrix in HBM.
    # TODO(synk): fuse this gather into the kernel (memory_space=pl.ANY on x +
    # per-M-tile pltpu.make_async_copy) so the duplicated matrix never hits HBM
    # for the overlapping 7x7/stride-4 MViT stem.
    if ph or pw:
        x = jnp.pad(x, ((0, 0), (0, 0), (ph, ph), (pw, pw)))
    hpad, wpad = h + 2 * ph, w + 2 * pw
    hp = (hpad - kh) // sh + 1
    wp = (wpad - kw) // sw + 1
    taps = []
    for u in range(kh):
        row = []
        for v in range(kw):
            sl = jax.lax.slice(
                x,
                (0, 0, u, v),
                (n, c, u + (hp - 1) * sh + 1, v + (wp - 1) * sw + 1),
                (1, 1, sh, sw),
            )                                              # (N, C, Hp, Wp)
            row.append(sl)
        taps.append(jnp.stack(row, axis=-1))               # (N, C, Hp, Wp, kw)
    patches = jnp.stack(taps, axis=-2)                     # (N, C, Hp, Wp, kh, kw)
    patches = jnp.transpose(patches, (0, 2, 3, 1, 4, 5))   # (N, Hp, Wp, C, kh, kw)
    return patches.reshape(n * hp * wp, c * kh * kw), hp, wp


def _choose_tm(m, cap_rows, block_m):
    """Pick the M tile size.

    Preference order:
      1. multiple of 16 (bf16 sublane packing) and <= min(block_m, VMEM cap),
      2. exactly divides the 16-aligned M (no pad copy / no post-call M slice),
      3. yields >= 2 grid steps so the "parallel" axis feeds both v7x cores.
    Returns (tm, m_pad).
    """
    m16 = _round_up(m, 16)
    cap = min(block_m, cap_rows, m16)
    cap = max(16, cap - cap % 16)
    fallback = None
    for t in range(cap, 15, -16):
        if m16 % t == 0:
            if m16 // t >= 2:
                return t, m16
            fallback = t                       # t == m16: single-step tile
    if fallback is not None:
        return fallback, m16
    return cap, _round_up(m, cap)              # no divisor: pad M up to tm


@functools.partial(
    jax.jit,
    static_argnames=("kernel_size", "stride", "padding", "block_m",
                     "compute_dtype", "out_dtype"),
)
def patch_embed_forward(x, weight, bias, *, kernel_size, stride, padding,
                        block_m=1024, compute_dtype=jnp.bfloat16,
                        out_dtype=None):
    """x: (N, C, H, W); weight: (E, C, kh, kw); bias: (E,).

    Returns (N, Hp, Wp, E) — equivalent to PyTorch PatchEmbed.forward.

    compute_dtype: matmul input dtype.  bf16 (default) doubles MXU throughput
      and halves the patch-stream bytes; pass jnp.float32 for exact parity
      with PyTorch's f32 Conv2d (accumulation is always f32 either way).
    out_dtype: output dtype (defaults to x.dtype).  Pass jnp.bfloat16 when the
      downstream network runs in bf16 — the output is the dominant HBM stream.
    """
    n = x.shape[0]
    e = weight.shape[0]
    if out_dtype is None:
        out_dtype = x.dtype

    # Cast before im2col so the wrapper's transpose/pad passes move bf16 bytes.
    patches, hp, wp = _im2col(x.astype(compute_dtype), kernel_size, stride,
                              padding)                         # (M, K)
    m, k = patches.shape

    # ---- TPU-friendly sizing -------------------------------------------------
    # E -> multiple of 128: output stores become full (unmasked) lane writes.
    e_pad = _round_up(e, 128)
    in_bytes = jnp.dtype(compute_dtype).itemsize
    out_bytes = jnp.dtype(out_dtype).itemsize
    # Streamed, double-buffered tiles (patches in, output out) per grid step.
    row_bytes = 2 * (k * in_bytes + e_pad * out_bytes)
    # Weight + bias stay resident (still allocated with 2 buffers by default).
    resident_bytes = 2 * (k * e_pad * in_bytes + e_pad * 4)
    # Keep the working set comfortably within v7x's 64 MiB physical VMEM per
    # TensorCore; v5e/v6e (128 MiB) could go larger but per-step overhead is
    # already amortized at these tile sizes.
    cap_rows = max(16, (40 * 2**20 - resident_bytes) // max(row_bytes, 1))
    tm, m_pad = _choose_tm(m, cap_rows, block_m)

    if m_pad != m:
        patches = jnp.pad(patches, ((0, m_pad - m), (0, 0)))

    w_mat = weight.reshape(e, k).T.astype(compute_dtype)       # (K, E)
    b_mat = bias.astype(jnp.float32).reshape(1, e)             # (1, E)
    if e_pad != e:
        w_mat = jnp.pad(w_mat, ((0, 0), (0, e_pad - e)))
        b_mat = jnp.pad(b_mat, ((0, 0), (0, e_pad - e)))

    vmem_need = tm * row_bytes + resident_bytes
    vmem_limit = int(min(max(vmem_need + (4 << 20), 32 << 20), 48 << 20))

    out_flat = pl.pallas_call(
        _patch_embed_kernel,
        out_shape=jax.ShapeDtypeStruct((m_pad, e_pad), out_dtype),
        grid_spec=pltpu.PrefetchScalarGridSpec(
            num_scalar_prefetch=0,
            grid=(m_pad // tm,),
            in_specs=[
                # Patches: streamed, double-buffered over the M grid axis.
                pl.BlockSpec((tm, k), lambda i: (i, 0)),
                # Weight: constant index -> DMA'd once, resident in VMEM.
                pl.BlockSpec((k, e_pad), lambda i: (0, 0)),
                # Bias: constant index -> resident in VMEM.
                pl.BlockSpec((1, e_pad), lambda i: (0, 0)),
            ],
            out_specs=pl.BlockSpec((tm, e_pad), lambda i: (i, 0)),
        ),
        compiler_params=pltpu.CompilerParams(
            # No cross-tile reduction: the M axis shards across v7x's two TCs.
            dimension_semantics=("parallel",),
            vmem_limit_bytes=vmem_limit,
        ),
    )(patches, w_mat, b_mat)

    if m_pad != m or e_pad != e:
        # TODO(synk): for E not a multiple of 128 (e.g. MViT E=96) consider
        # masked width-E stores, or let downstream consume the padded E, to
        # avoid this extra read+write pass over the output.
        out_flat = out_flat[:m, :e]
    return out_flat.reshape(n, hp, wp, e)


def _reference(x, weight, bias, kernel_size, stride, padding):
    """Pure-JAX reference using conv_general_dilated (NCHW, like PyTorch)."""
    y = jax.lax.conv_general_dilated(
        x, weight,
        window_strides=stride,
        padding=[(padding[0], padding[0]), (padding[1], padding[1])],
        dimension_numbers=("NCHW", "OIHW", "NCHW"),
        precision=jax.lax.Precision.HIGHEST,
    ) + bias.reshape(1, -1, 1, 1)
    return jnp.transpose(y, (0, 2, 3, 1))


def _run_case(key, *, batch, in_chans, H, W, embed_dim, kernel_size, stride,
              padding):
    kx, kw_, kb = jax.random.split(key, 3)
    x = jax.random.normal(kx, (batch, in_chans, H, W), dtype=jnp.float32)
    weight = 0.05 * jax.random.normal(
        kw_, (embed_dim, in_chans, kernel_size[0], kernel_size[1]),
        dtype=jnp.float32)
    bias = 0.01 * jax.random.normal(kb, (embed_dim,), dtype=jnp.float32)

    out = patch_embed_forward(
        x, weight, bias, kernel_size=kernel_size, stride=stride,
        padding=padding)
    out = jax.block_until_ready(out)

    # Tight check: reference computed with the same bf16 input rounding.
    ref_bf16_in = _reference(
        x.astype(jnp.bfloat16).astype(jnp.float32),
        weight.astype(jnp.bfloat16).astype(jnp.float32),
        bias, kernel_size, stride, padding)
    # Loose check: full-precision f32 reference (error bounded by bf16 input
    # rounding; accumulation stays f32).
    ref_f32 = _reference(x, weight, bias, kernel_size, stride, padding)

    assert out.shape == ref_f32.shape, (out.shape, ref_f32.shape)
    assert jnp.allclose(out, ref_bf16_in, atol=1e-3, rtol=1e-3), float(
        jnp.max(jnp.abs(out - ref_bf16_in)))
    assert jnp.allclose(out, ref_f32, atol=5e-2, rtol=5e-2), float(
        jnp.max(jnp.abs(out - ref_f32)))
    return out


if __name__ == "__main__":
    key = jax.random.PRNGKey(0)
    k1, k2 = jax.random.split(key)

    # Standard PatchEmbed config: non-overlapping patches (fast im2col path).
    out1 = _run_case(k1, batch=2, in_chans=3, H=16, W=16, embed_dim=32,
                     kernel_size=(4, 4), stride=(4, 4), padding=(0, 0))
    assert out1.shape == (2, 4, 4, 32), out1.shape

    # MViT-style overlapping stem: exercises the general im2col path.
    out2 = _run_case(k2, batch=2, in_chans=4, H=16, W=16, embed_dim=32,
                     kernel_size=(3, 3), stride=(2, 2), padding=(1, 1))
    assert out2.shape == (2, 8, 8, 32), out2.shape

    print("KERNEL_OK")
</pallas_src>

<mosaic_0001>
module attributes {stable_mosaic.version = 11 : i64} {
  func.func @_patch_embed_kernel(%arg0: i32, %arg1: memref<16x48xbf16, #tpu.memory_space<vmem>>, %arg2: memref<48x128xbf16, #tpu.memory_space<vmem>>, %arg3: memref<1x128xf32, #tpu.memory_space<vmem>>, %arg4: memref<16x128xf32, #tpu.memory_space<vmem>>) attributes {dimension_semantics = [#tpu.dimension_semantics<parallel>], iteration_bounds = array<i64: 2>, scalar_prefetch = 0 : i64, scratch_operands = 0 : i64, tpu.core_type = #tpu.core_type<tc>, window_params = [{transform_indices = @transform_0, window_bounds = array<i64: 16, 48>}, {pipeline_mode = #tpu.pipeline_mode<synchronous>, transform_indices = @transform_1, window_bounds = array<i64: 48, 128>}, {pipeline_mode = #tpu.pipeline_mode<synchronous>, transform_indices = @transform_2, window_bounds = array<i64: 1, 128>}, {transform_indices = @transform_3, window_bounds = array<i64: 16, 128>}]} {
    %c0 = arith.constant 0 : index
    %c0_0 = arith.constant 0 : index
    %0 = vector.load %arg1[%c0, %c0_0] : memref<16x48xbf16, #tpu.memory_space<vmem>>, vector<16x48xbf16>
    %c0_1 = arith.constant 0 : index
    %c0_2 = arith.constant 0 : index
    %1 = vector.load %arg2[%c0_1, %c0_2] : memref<48x128xbf16, #tpu.memory_space<vmem>>, vector<48x128xbf16>
    %cst = arith.constant dense<0.000000e+00> : vector<16x128xf32>
    %2 = tpu.matmul %0, %1, %cst {dimension_numbers = #tpu.dot_dimension_numbers<[1], [0], [0], [1], [0, 0, 1, 1], [], []>} : vector<16x48xbf16>, vector<48x128xbf16>, vector<16x128xf32> -> vector<16x128xf32>
    %c0_3 = arith.constant 0 : index
    %c0_4 = arith.constant 0 : index
    %3 = vector.load %arg3[%c0_3, %c0_4] : memref<1x128xf32, #tpu.memory_space<vmem>>, vector<1x128xf32>
    %4 = vector.broadcast %3 : vector<1x128xf32> to vector<16x128xf32>
    %5 = arith.addf %2, %4 : vector<16x128xf32>
    %c0_5 = arith.constant 0 : index
    %c0_6 = arith.constant 0 : index
    %6 = vector.load %arg4[%c0_5, %c0_6] : memref<16x128xf32, #tpu.memory_space<vmem>>, vector<16x128xf32>
    tpu.vector_store %arg4[%c0_5, %c0_6], %5 {strides = array<i32>} : memref<16x128xf32, #tpu.memory_space<vmem>>, vector<16x128xf32>,
    return
  }
  func.func @transform_0(%arg0: i32) -> (i32, i32) {
    %c0_i32 = arith.constant 0 : i32
    %c0_i32_0 = arith.constant 0 : i32
    return %arg0, %c0_i32 : i32, i32
  }
  func.func @transform_1(%arg0: i32) -> (i32, i32) {
    %c0_i32 = arith.constant 0 : i32
    %c0_i32_0 = arith.constant 0 : i32
    %c0_i32_1 = arith.constant 0 : i32
    return %c0_i32, %c0_i32_0 : i32, i32
  }
  func.func @transform_2(%arg0: i32) -> (i32, i32) {
    %c0_i32 = arith.constant 0 : i32
    %c0_i32_0 = arith.constant 0 : i32
    %c0_i32_1 = arith.constant 0 : i32
    return %c0_i32, %c0_i32_0 : i32, i32
  }
  func.func @transform_3(%arg0: i32) -> (i32, i32) {
    %c0_i32 = arith.constant 0 : i32
    %c0_i32_0 = arith.constant 0 : i32
    return %arg0, %c0_i32 : i32, i32
  }
}

</mosaic_0001>

<bundles_post_ra>
// kernel: patch_embed_forward.1
= control target key start
LH: loop header
LB: loop body
LE: loop exit
PB: predicated region body
PF: predicated region fallthrough
CT: control target
= control target key end

     0   :  { %8 = vsyncpa [#allocation3], 0  ;;  %s617_s0 = inlined_call_operand.vmem [shape: bf16[32,48], index: 0, kind: input, shape index: {}]   ;;  %s618_s1 = inlined_call_operand.vmem [shape: bf16[48,128], index: 1, kind: input, shape index: {}]   ;;  %s619_s2 = inlined_call_operand.vmem [shape: f32[1,128], index: 2, kind: input, shape index: {}]   ;;  %s620_s3 = inlined_call_operand.hbm [shape: f32[32,128], index: 3, kind: output, shape index: {}]  }
   0x1   :  { %10 = vsyncpa [#allocation3 + $0x1], 0  ;;  %s503_s12 = smov 0   ;;  %s505_s13 = smov 0  }
   0x2   :  { %s507_s14 = smov 0   ;;  %s509_s15 = smov 0  }
   0x3 LB: > { %s524_s16 = sadd.s32 4294967295, %s476_s15   ;;  %s334_s17 = sadd.s32 4294967294, %s476_s15   ;;  %s476_s15 = sphi %s509_s15, %s626_s15   ;;  %s472_s14 = sphi %s507_s14, %s625_s14   ;;  %s468_s13 = sphi %s505_s13, %s624_s13   ;;  %s464_s12 = sphi %s503_s12, %s623_s12  }
   0x4   : > { %s528_s18 = sadd.s32 1, %s476_s15   ;;  %s91_s19 = sadd.s32 1, %s472_s14 }
   0x5   : > { %s88_s20 = ssub.s32 %s476_s15, %s528_s18  ;;  %p101_p0 = scmp.ne.s32.totalorder %s472_s14, %s468_s13 }
   0x6   : > { %p89_p1 = scmp.eq.s32.totalorder %s88_s20, 0  ;;  %p102_p2 = scmp.eq.s32.totalorder %s524_s16, 1 }
   0x7   : > { %p107_p3 = scmp.ne.s32.totalorder %s468_s13, %s464_s12  ;;  %p108_p4 = scmp.eq.s32.totalorder %s334_s17, 1 }
   0x8   : > { %s539_s21 = scalar_select %p89_p1, %s472_s14, %s91_s19  }
   0x9   : > { %p541_p5 = por %p102_p2, %p101_p0  ;;  %p545_p6 = por %p108_p4, %p107_p3 }
   0xa   : > { %p337_p7 = scmp.ge.s32.totalorder %s476_s15, 1  ;;  %p141_p8 = scmp.lt.s32.totalorder %s476_s15, 3 }
   0xc   : > { %p142_p9 = pnand %p337_p7, %p141_p8 }
   0xd   : > { %v410_v0 = vld [vmem:[%s618_s1] sm:$0xff] (!%p142_p9)   ;;  %v478_v1 = vmov (!%p142_p9), 0.0   ;;  %v411_v2 = vld [vmem:[%s618_s1 + $0x8] sm:$0xff] (!%p142_p9)   ;;  %vm479_vm0 = vmmov (!%p142_p9), 0   ;;  %s339_s28 = sshll.u32 (!%p142_p9), %s524_s16, 1  ;;  %v412_v3 = vld [vmem:[%s618_s1 + $0x10] sm:$0xff] (!%p142_p9)  }
   0xe   : > { %145 = sbr.rel (%p142_p9) target bundleno = 257 (0x101), region = 32  ;;  %357 = vmatprep.subr.bf16.mxu0 (!%p142_p9), %v478_v1  ;;  %363 = vmatprep.mubr.msk.bf16.mxu0 (!%p142_p9), %vm479_vm0, %v478_v1  ;;  %p166_p10 = scmp.lt.s32.totalorder (!%p142_p9), %s339_s28, 3  ;;  %vm211_vm1 = vcmask (!%p142_p9), 392192   ;;  %v341_v5 = vld [vmem:[%s619_s2] ss:$0 sm:$0xff] (!%p142_p9) }
   0xf   : > { %358 = vmatpush3.bf16.msra.mxu0 (!%p142_p9), %v410_v0  ;;  %s162_s8 = sand.u32 (!%p142_p9), 1, %s468_s13   ;;  %s352_s20 = sshll.u32 (!%p142_p9), %s524_s16, 8 }
  0x10   : > { %359 = vmatprep.subr.bf16.mxu0 (!%p142_p9), %v478_v1  ;;  %s338_s9 = sshll.u32 (!%p142_p9), %s162_s8, 4  ;;  %s574_s26 = scalar_lea.hbm (!%p142_p9), %s620_s3, %s352_s20 }
  0x11   : > { %s164_s17 = scalar_lea.vmem (!%p142_p9), [#allocation2], %s338_s9  ;;  %s576_s27 = scalar_lea.sflag (!%p142_p9), [#allocation3], %s162_s8 }
  0x12   : > { %s272_s19 = sshll.u32 (!%p142_p9), %s164_s17, 4  ;;  %s569_s19 = int_to_ptr.vmem [resolvable:$true] %s272_s19 }
  0x13   : > { %360 = vmatpush3.bf16.msra.mxu0 (!%p142_p9), %v411_v2  ;;  %s414_s16 = scalar_lea.vmem (!%p142_p9), %s569_s19, 256 }
  0x14   : > { %361 = vmatprep.subr.bf16.mxu0 (!%p142_p9), %v478_v1  ;;  %p415_p11 = scmp.ne.s32.totalorder (!%p142_p9), %s569_s19, %s414_s16 }
  0x15   : > { %s628_s28 = smov (!%p166_p10, %s339_s28), 3 }
  0x16   : > { %s340_s4 = sshll.u32 %s628_s28, 2  ;;  %p416_p12 = pnand %p415_p11, %p541_p5 }
  0x17   : > { %s169_s7 = scalar_lea.vmem %s617_s0, %s340_s4  ;;  %362 = vmatpush3.bf16.msra.mxu0 %v412_v3  ;;  %s480_s28 = smov [#allocation2]  }
  0x18   : > { %v413_v4 = vld [vmem:[%s169_s7] sm:$0xff]   ;;  %p417_p13 = pneg %p416_p12  ;;  %s418_s29 = sshll.u32 %s480_s28, 4  ;;  %s419_s29 = int_to_ptr.vmem [resolvable:$false] %s418_s29 }
  0x19   : > { %s420_s30 = scalar_lea.vmem %s419_s29, 512  ;;  %p421_p0 = scmp.lt.s32.totalorder %s569_s19, %s419_s29 }
  0x1a   : > { %364 = vmatmul.mubr.msk.bf16.vlgmr.msra.gmra.mrb[0].mxu0 %vm211_vm1, %v413_v4  ;;  %p422_p1 = scmp.lt.s32.totalorder %s420_s30, %s414_s16 }
  0x1c   : > { %p423_p2 = por %p422_p1, %p421_p0 }
  0x1e   : > { %p424_p3 = pnand %p423_p2, %p417_p13 }
  0xed   : > { %v249_v6 = vpop.f32.mrb[0].mxu0 }
  0xee   : > { %v250_v7 = vadd.f32 %v341_v5, %v249_v6  ;;  %v365_v8 = vpop.f32.mrb[1].mxu0 }
  0xef   : > { %v252_v9 = vpop.f32.mrb[2].mxu0 }
  0xf0   : > { %256 = vst [vmem:[%s164_s17] sm:$0xff] %v250_v7  ;;  %v253_v10 = vadd.f32 %v341_v5, %v252_v9  ;;  %v366_v11 = vpop.f32.mrb[3].mxu0 }
  0xf2   : > { %257 = vst [vmem:[%s164_s17 + $0x8] sm:$0xff] %v253_v10 }
  0xf3   : > { %427 = shalt.err (!%p424_p3)
}
  0xf4   : > { %s428_s4 = scalar_lea.hbm %s574_s26, 256  ;;  %s432_s7 = scalar_lea.hbm %s620_s3, 512 }
  0xf5   : > { %p429_p4 = scmp.ne.s32.totalorder %s574_s26, %s428_s4  ;;  %p433_p9 = scmp.lt.u32.totalorder %s574_s26, %s620_s3 }
  0xf6   : > { %p434_p10 = scmp.lt.u32.totalorder %s432_s7, %s428_s4  ;;  %p436_p12 = scmp.lt.u32.totalorder %s428_s4, %s574_s26 }
  0xf7   : > { %p430_p7 = pnand %p429_p4, %p541_p5 }
  0xf8   : > { %p435_p11 = por %p434_p10, %p433_p9 }
  0xf9   : > { %p431_p8 = pneg %p430_p7 }
  0xfa   : > { %p437_p13 = por %p436_p12, %p435_p11 }
  0xfc   : > { %p438_p0 = pnand %p437_p13, %p431_p8 }
  0xfe   : > { %441 = shalt.err (!%p438_p0)
}
  0xff   : > { %s481_s10 = smov 128   ;;  %s482_s11 = smov 8  }
 0x100   : > { %367 = dma.vmem_to_hbm [thread:$0]  (%p541_p5), %s569_s19, 256, %s574_s26, %s576_s27, %s481_s10, %s481_s10, %s482_s11  }
 0x101 PF: > { %p373_p1 = scmp.ge.s32.totalorder %s476_s15, 2  ;;  %s287_s17 = sand.u32 1, %s464_s12  }
 0x102   : > { %s288_s20 = scalar_lea.sflag [#allocation3], %s287_s17 }
 0x103   : > { %p370_p2 = pnand %p373_p1, %p545_p6 }
 0x105   : > { %459 = dma.done.wait (!%p370_p2), %s288_s20, 256  }
 0x106   : > { %461 = vsyncadd (!%p370_p2), %s288_s20, 4294967040  ;;  %p13_p3 = scmp.ge.s32.totalorder %s528_s18, 4   ;;  %s623_s12 = smov %s468_s13 }
 0x107   : > { %s624_s13 = smov %s472_s14  ;;  %s625_s14 = smov %s539_s21 }
 0x108   : > { %s626_s15 = smov %s528_s18  ;;  %15 = sbr.rel (!%p13_p3) target bundleno = 3 (0x3), region = 67 }
 0x10f   :  { %293 = vsyncpa [#allocation3], 1 }
 0x110   :  { %295 = vsyncpa [#allocation3 + $0x1], 1 }

</bundles_post_ra>
